<compile_context>
chip_gen: v6e
topology: v6e:2x2x1
jax: 0.10.0
libtpu: 0.0.40
codegen_flags: <defaults>
</compile_context>

<pallas_src>
import jax
import jax.numpy as jnp
from jax import lax
from jax.experimental import pallas as pl
from jax.experimental.pallas import tpu as pltpu


def _make_bottleneck_kernel(H, W, planes, c_in, c_out, dilation):
    HW = H * W
    w_pow2 = (W & (W - 1)) == 0

    def _col_index(flat_idx):
        # w = flat_idx % W (cheap bitwise-and when W is a power of two)
        if w_pow2:
            return jnp.bitwise_and(flat_idx, W - 1)
        return flat_idx % W

    def kernel(x_ref, w1_ref, w2_ref, w3_ref, bias_ref, ecam_ref, out_ref):
        x = x_ref[0]                           # (c_in, HW) f32
        # per-channel biases (folded BN betas), packed into one block
        b1 = bias_ref[0:planes, 0:1]           # (planes, 1)
        b2 = bias_ref[0:planes, 1:2]           # (planes, 1)
        b3 = bias_ref[0:c_out, 2:3]            # (c_out, 1)

        # ---- conv1 (1x1, BN1 folded) + ReLU --------------------------------
        a1 = jnp.dot(w1_ref[...], x, preferred_element_type=jnp.float32) + b1
        a1 = jnp.maximum(a1, 0.0)              # (planes, HW)

        # ---- conv2 (3x3, dilation d, stride 1, pad d; BN2 folded) + ReLU ----
        # Each tap (ky, kx) reads a1 shifted by (ky-1)*d rows, (kx-1)*d cols.
        # In the flattened layout that is a lane roll by oy*W+ox with the
        # out-of-image positions masked to zero.
        flat = lax.broadcasted_iota(jnp.int32, (planes, HW), 1)
        col = _col_index(flat)
        d = dilation
        acc = jnp.zeros((planes, HW), jnp.float32)
        for ky in range(3):
            for kx in range(3):
                oy = (ky - 1) * d
                ox = (kx - 1) * d
                off = oy * W + ox
                if off == 0:
                    tap_in = a1
                else:
                    tap_in = pltpu.roll(a1, shift=(-off) % HW, axis=1)
                valid = None
                if oy < 0:
                    valid = flat >= (-oy) * W
                elif oy > 0:
                    valid = flat < HW - oy * W
                if ox < 0:
                    vc = col >= -ox
                    valid = vc if valid is None else jnp.logical_and(valid, vc)
                elif ox > 0:
                    vc = col < W - ox
                    valid = vc if valid is None else jnp.logical_and(valid, vc)
                if valid is not None:
                    tap_in = jnp.where(valid, tap_in, 0.0)
                acc = acc + jnp.dot(w2_ref[ky * 3 + kx], tap_in,
                                    preferred_element_type=jnp.float32)
        a2 = jnp.maximum(acc + b2, 0.0)        # (planes, HW)

        # ---- conv3 (1x1, BN3 folded) ---------------------------------------
        a3 = jnp.dot(w3_ref[...], a2, preferred_element_type=jnp.float32) + b3
        # (c_out, HW)

        # ---- ECA channel attention -----------------------------------------
        # gate = sigmoid(conv1d_k3(avgpool(a3)));  band @ rowmean(a3) ==
        # rowmean(band @ a3), so use a well-shaped (C,C)@(C,HW) matmul.
        z = jnp.sum(jnp.dot(ecam_ref[...], a3,
                            preferred_element_type=jnp.float32),
                    axis=1, keepdims=True) * (1.0 / HW)        # (c_out, 1)
        gate = pl.reciprocal(1.0 + jnp.exp(-z), approx=False)  # sigmoid
        y = a3 * gate

        # ---- residual add + ReLU -------------------------------------------
        out = jnp.maximum(y + x, 0.0)
        out_ref[0] = out.astype(out_ref.dtype)

    return kernel


def bottleneck_forward(x, params, *, dilation=1):
    """Bottleneck forward (stride=1, downsample=None, eval-mode BN).

    x: (B, inplanes, H, W) f32 -> (B, planes*4, H, W) f32.
    """
    # TODO(synk): stride != 1 and an explicit `downsample` branch are not
    # implemented (module defaults: stride=1, dilation=1, downsample=None).
    B, c_in, H, W = x.shape
    w1 = params['conv1_w']                     # (planes, inplanes)
    w2 = params['conv2_w']                     # (planes, planes, 3, 3)
    w3 = params['conv3_w']                     # (planes*4, planes)
    planes = w1.shape[0]
    c_out = w3.shape[0]
    assert c_out == c_in, "downsample=None path requires inplanes == planes*4"
    HW = H * W
    eps = 1e-5

    # InPlaceABNSync(activation='identity') == BatchNorm2d; fold (eval-mode)
    # BN scale into the conv weights, keep only a per-channel bias.
    def bn_fold(g, b, m, v):
        s = g * lax.rsqrt(v + eps)
        return s, b - s * m

    s1, t1 = bn_fold(params['bn1_g'], params['bn1_b'], params['bn1_m'], params['bn1_v'])
    s2, t2 = bn_fold(params['bn2_g'], params['bn2_b'], params['bn2_m'], params['bn2_v'])
    s3, t3 = bn_fold(params['bn3_g'], params['bn3_b'], params['bn3_m'], params['bn3_v'])

    w1f = (s1[:, None] * w1).astype(jnp.float32)                       # (planes, c_in)
    w2f = s2[:, None, None, None] * w2                                 # (planes, planes, 3, 3)
    w2taps = jnp.transpose(w2f, (2, 3, 0, 1)).reshape(9, planes, planes).astype(jnp.float32)
    w3f = (s3[:, None] * w3).astype(jnp.float32)                       # (c_out, planes)

    # Pack all per-channel biases into ONE small block (avoids several padded
    # (C,1) VMEM blocks / extra DMAs per grid step).
    biases = jnp.zeros((c_out, 3), jnp.float32)
    biases = biases.at[:planes, 0].set(t1)
    biases = biases.at[:planes, 1].set(t2)
    biases = biases.at[:, 2].set(t3)

    # ECA 1-D (k=3, pad=1) channel conv as a banded (c_out, c_out) matrix.
    k = params['eca_w']                                                # (3,)
    ecam = (k[0] * jnp.eye(c_out, k=-1) + k[1] * jnp.eye(c_out)
            + k[2] * jnp.eye(c_out, k=1)).astype(jnp.float32)

    x_flat = x.reshape(B, c_in, HW).astype(jnp.float32)

    kernel = _make_bottleneck_kernel(H, W, planes, c_in, c_out, dilation)

    out_flat = pl.pallas_call(
        kernel,
        out_shape=jax.ShapeDtypeStruct((B, c_out, HW), jnp.float32),
        grid_spec=pltpu.PrefetchScalarGridSpec(
            num_scalar_prefetch=0,
            grid=(B,),
            in_specs=[
                pl.BlockSpec((1, c_in, HW), lambda b: (b, 0, 0)),
                pl.BlockSpec((planes, c_in), lambda b: (0, 0)),
                pl.BlockSpec((9, planes, planes), lambda b: (0, 0, 0)),
                pl.BlockSpec((c_out, planes), lambda b: (0, 0)),
                pl.BlockSpec((c_out, 3), lambda b: (0, 0)),
                pl.BlockSpec((c_out, c_out), lambda b: (0, 0)),
            ],
            out_specs=pl.BlockSpec((1, c_out, HW), lambda b: (b, 0, 0)),
        ),
        compiler_params=pltpu.CompilerParams(
            dimension_semantics=("parallel",)),
    )(x_flat, w1f, w2taps, w3f, biases, ecam)

    return out_flat.reshape(B, c_out, H, W)


def reference_forward(x, params, *, dilation=1):
    """Pure-JAX reference mirroring the PyTorch Bottleneck.forward (eval BN)."""
    eps = 1e-5
    hi = lax.Precision.HIGHEST

    def bn(y, g, b, m, v):
        return (g[None, :, None, None] * (y - m[None, :, None, None])
                * lax.rsqrt(v + eps)[None, :, None, None] + b[None, :, None, None])

    w1, w2, w3 = params['conv1_w'], params['conv2_w'], params['conv3_w']
    y = jnp.einsum('oi,bihw->bohw', w1, x, precision=hi)
    y = jax.nn.relu(bn(y, params['bn1_g'], params['bn1_b'], params['bn1_m'], params['bn1_v']))
    y = lax.conv_general_dilated(
        y, w2, window_strides=(1, 1),
        padding=((dilation, dilation), (dilation, dilation)),
        rhs_dilation=(dilation, dilation),
        dimension_numbers=('NCHW', 'OIHW', 'NCHW'), precision=hi)
    y = jax.nn.relu(bn(y, params['bn2_g'], params['bn2_b'], params['bn2_m'], params['bn2_v']))
    y = jnp.einsum('oi,bihw->bohw', w3, y, precision=hi)
    y = bn(y, params['bn3_g'], params['bn3_b'], params['bn3_m'], params['bn3_v'])
    # eca: avgpool -> conv1d(k=3, pad=1, no bias) over channels -> sigmoid gate
    m = jnp.mean(y, axis=(2, 3))                      # (B, C)
    kk = params['eca_w']
    mp = jnp.pad(m, ((0, 0), (1, 1)))
    z = kk[0] * mp[:, :-2] + kk[1] * mp[:, 1:-1] + kk[2] * mp[:, 2:]
    gate = jax.nn.sigmoid(z)[:, :, None, None]
    y = y * gate
    return jax.nn.relu(y + x)


if __name__ == "__main__":
    B, inplanes, planes = 2, 16, 4
    H = W = 16
    c_out = planes * 4        # == inplanes, so the downsample=None residual works

    key = jax.random.PRNGKey(0)
    ks = jax.random.split(key, 8)

    def nrm(k, shape, scale):
        return scale * jax.random.normal(k, shape, dtype=jnp.float32)

    def make_bn(k, c):
        k1, k2, k3, k4 = jax.random.split(k, 4)
        return {
            'g': 1.0 + 0.1 * jax.random.normal(k1, (c,), jnp.float32),
            'b': 0.1 * jax.random.normal(k2, (c,), jnp.float32),
            'm': 0.1 * jax.random.normal(k3, (c,), jnp.float32),
            'v': 0.5 + jax.random.uniform(k4, (c,), jnp.float32),
        }

    bn1 = make_bn(ks[3], planes)
    bn2 = make_bn(ks[4], planes)
    bn3 = make_bn(ks[5], c_out)

    params = {
        'conv1_w': nrm(ks[0], (planes, inplanes), 1.0 / float(inplanes) ** 0.5),
        'conv2_w': nrm(ks[1], (planes, planes, 3, 3), 1.0 / float(9 * planes) ** 0.5),
        'conv3_w': nrm(ks[2], (c_out, planes), 1.0 / float(planes) ** 0.5),
        'bn1_g': bn1['g'], 'bn1_b': bn1['b'], 'bn1_m': bn1['m'], 'bn1_v': bn1['v'],
        'bn2_g': bn2['g'], 'bn2_b': bn2['b'], 'bn2_m': bn2['m'], 'bn2_v': bn2['v'],
        'bn3_g': bn3['g'], 'bn3_b': bn3['b'], 'bn3_m': bn3['m'], 'bn3_v': bn3['v'],
        'eca_w': nrm(ks[6], (3,), 0.5),
    }

    x = jax.random.normal(ks[7], (B, inplanes, H, W), dtype=jnp.float32)

    out = bottleneck_forward(x, params)
    out = jax.block_until_ready(out)

    ref = reference_forward(x, params)
    assert out.shape == (B, c_out, H, W)
    max_err = float(jnp.max(jnp.abs(out - ref)))
    assert jnp.allclose(out, ref, atol=2e-3, rtol=2e-3), f"mismatch vs reference: {max_err}"

    print("KERNEL_OK")
</pallas_src>

<mosaic_0001>
module attributes {stable_mosaic.version = 11 : i64} {
  func.func @kernel(%arg0: i32, %arg1: memref<1x16x256xf32, #tpu.memory_space<vmem>>, %arg2: memref<4x16xf32, #tpu.memory_space<vmem>>, %arg3: memref<9x4x4xf32, #tpu.memory_space<vmem>>, %arg4: memref<16x4xf32, #tpu.memory_space<vmem>>, %arg5: memref<16x3xf32, #tpu.memory_space<vmem>>, %arg6: memref<16x16xf32, #tpu.memory_space<vmem>>, %arg7: memref<1x16x256xf32, #tpu.memory_space<vmem>>) attributes {dimension_semantics = [#tpu.dimension_semantics<parallel>], iteration_bounds = array<i64: 2>, scalar_prefetch = 0 : i64, scratch_operands = 0 : i64, tpu.core_type = #tpu.core_type<tc>, window_params = [{transform_indices = @transform_0, window_bounds = array<i64: 1, 16, 256>}, {pipeline_mode = #tpu.pipeline_mode<synchronous>, transform_indices = @transform_1, window_bounds = array<i64: 4, 16>}, {pipeline_mode = #tpu.pipeline_mode<synchronous>, transform_indices = @transform_2, window_bounds = array<i64: 9, 4, 4>}, {pipeline_mode = #tpu.pipeline_mode<synchronous>, transform_indices = @transform_3, window_bounds = array<i64: 16, 4>}, {pipeline_mode = #tpu.pipeline_mode<synchronous>, transform_indices = @transform_4, window_bounds = array<i64: 16, 3>}, {pipeline_mode = #tpu.pipeline_mode<synchronous>, transform_indices = @transform_5, window_bounds = array<i64: 16, 16>}, {transform_indices = @transform_6, window_bounds = array<i64: 1, 16, 256>}]} {
    %c0 = arith.constant 0 : index
    %c0_0 = arith.constant 0 : index
    %c0_1 = arith.constant 0 : index
    %0 = vector.load %arg1[%c0, %c0_0, %c0_1] : memref<1x16x256xf32, #tpu.memory_space<vmem>>, vector<1x16x256xf32>
    %1 = vector.shape_cast %0 : vector<1x16x256xf32> to vector<16x256xf32>
    %c0_2 = arith.constant 0 : index
    %c0_3 = arith.constant 0 : index
    %2 = vector.load %arg5[%c0_2, %c0_3] : memref<16x3xf32, #tpu.memory_space<vmem>>, vector<4x1xf32>
    %c0_4 = arith.constant 0 : index
    %c1 = arith.constant 1 : index
    %3 = vector.load %arg5[%c0_4, %c1] : memref<16x3xf32, #tpu.memory_space<vmem>>, vector<4x1xf32>
    %c0_5 = arith.constant 0 : index
    %c2 = arith.constant 2 : index
    %4 = vector.load %arg5[%c0_5, %c2] : memref<16x3xf32, #tpu.memory_space<vmem>>, vector<16x1xf32>
    %c0_6 = arith.constant 0 : index
    %c0_7 = arith.constant 0 : index
    %5 = vector.load %arg2[%c0_6, %c0_7] : memref<4x16xf32, #tpu.memory_space<vmem>>, vector<4x16xf32>
    %cst = arith.constant dense<0.000000e+00> : vector<4x256xf32>
    %6 = tpu.matmul %5, %1, %cst {dimension_numbers = #tpu.dot_dimension_numbers<[1], [0], [0], [1], [0, 0, 1, 1], [], []>} : vector<4x16xf32>, vector<16x256xf32>, vector<4x256xf32> -> vector<4x256xf32>
    %7 = vector.broadcast %2 : vector<4x1xf32> to vector<4x256xf32>
    %8 = arith.addf %6, %7 : vector<4x256xf32>
    %cst_8 = arith.constant 0.000000e+00 : f32
    %9 = vector.broadcast %cst_8 : f32 to vector<4x256xf32>
    %10 = arith.maximumf %8, %9 : vector<4x256xf32>
    %11 = tpu.iota {dimensions = array<i32: 1>} : vector<4x256xi32>
    %c15_i32 = arith.constant 15 : i32
    %12 = vector.broadcast %c15_i32 : i32 to vector<4x256xi32>
    %13 = arith.andi %11, %12 : vector<4x256xi32>
    %cst_9 = arith.constant 0.000000e+00 : f32
    %14 = vector.broadcast %cst_9 : f32 to vector<4x256xf32>
    %c17_i32 = arith.constant 17 : i32
    %15 = tpu.dynamic_rotate %10 by %c17_i32 dim 1 : vector<4x256xf32>, i32 -> vector<4x256xf32>
    %c16_i32 = arith.constant 16 : i32
    %16 = vector.broadcast %c16_i32 : i32 to vector<4x256xi32>
    %17 = arith.cmpi sge, %11, %16 : vector<4x256xi32>
    %c1_i32 = arith.constant 1 : i32
    %18 = vector.broadcast %c1_i32 : i32 to vector<4x256xi32>
    %19 = arith.cmpi sge, %13, %18 : vector<4x256xi32>
    %20 = arith.andi %17, %19 : vector<4x256xi1>
    %cst_10 = arith.constant 0.000000e+00 : f32
    %21 = vector.broadcast %cst_10 : f32 to vector<4x256xf32>
    %22 = arith.select %20, %15, %21 : vector<4x256xi1>, vector<4x256xf32>
    %c0_11 = arith.constant 0 : index
    %c0_12 = arith.constant 0 : index
    %c0_13 = arith.constant 0 : index
    %23 = vector.load %arg3[%c0_11, %c0_12, %c0_13] : memref<9x4x4xf32, #tpu.memory_space<vmem>>, vector<1x4x4xf32>
    %24 = vector.shape_cast %23 : vector<1x4x4xf32> to vector<4x4xf32>
    %cst_14 = arith.constant dense<0.000000e+00> : vector<4x256xf32>
    %25 = tpu.matmul %24, %22, %cst_14 {dimension_numbers = #tpu.dot_dimension_numbers<[1], [0], [0], [1], [0, 0, 1, 1], [], []>} : vector<4x4xf32>, vector<4x256xf32>, vector<4x256xf32> -> vector<4x256xf32>
    %26 = arith.addf %14, %25 : vector<4x256xf32>
    %c16_i32_15 = arith.constant 16 : i32
    %27 = tpu.dynamic_rotate %10 by %c16_i32_15 dim 1 : vector<4x256xf32>, i32 -> vector<4x256xf32>
    %c16_i32_16 = arith.constant 16 : i32
    %28 = vector.broadcast %c16_i32_16 : i32 to vector<4x256xi32>
    %29 = arith.cmpi sge, %11, %28 : vector<4x256xi32>
    %cst_17 = arith.constant 0.000000e+00 : f32
    %30 = vector.broadcast %cst_17 : f32 to vector<4x256xf32>
    %31 = arith.select %29, %27, %30 : vector<4x256xi1>, vector<4x256xf32>
    %c1_18 = arith.constant 1 : index
    %c0_19 = arith.constant 0 : index
    %c0_20 = arith.constant 0 : index
    %32 = vector.load %arg3[%c1_18, %c0_19, %c0_20] : memref<9x4x4xf32, #tpu.memory_space<vmem>>, vector<1x4x4xf32>
    %33 = vector.shape_cast %32 : vector<1x4x4xf32> to vector<4x4xf32>
    %cst_21 = arith.constant dense<0.000000e+00> : vector<4x256xf32>
    %34 = tpu.matmul %33, %31, %cst_21 {dimension_numbers = #tpu.dot_dimension_numbers<[1], [0], [0], [1], [0, 0, 1, 1], [], []>} : vector<4x4xf32>, vector<4x256xf32>, vector<4x256xf32> -> vector<4x256xf32>
    %35 = arith.addf %26, %34 : vector<4x256xf32>
    %c15_i32_22 = arith.constant 15 : i32
    %36 = tpu.dynamic_rotate %10 by %c15_i32_22 dim 1 : vector<4x256xf32>, i32 -> vector<4x256xf32>
    %c16_i32_23 = arith.constant 16 : i32
    %37 = vector.broadcast %c16_i32_23 : i32 to vector<4x256xi32>
    %38 = arith.cmpi sge, %11, %37 : vector<4x256xi32>
    %c15_i32_24 = arith.constant 15 : i32
    %39 = vector.broadcast %c15_i32_24 : i32 to vector<4x256xi32>
    %40 = arith.cmpi slt, %13, %39 : vector<4x256xi32>
    %41 = arith.andi %38, %40 : vector<4x256xi1>
    %cst_25 = arith.constant 0.000000e+00 : f32
    %42 = vector.broadcast %cst_25 : f32 to vector<4x256xf32>
    %43 = arith.select %41, %36, %42 : vector<4x256xi1>, vector<4x256xf32>
    %c2_26 = arith.constant 2 : index
    %c0_27 = arith.constant 0 : index
    %c0_28 = arith.constant 0 : index
    %44 = vector.load %arg3[%c2_26, %c0_27, %c0_28] : memref<9x4x4xf32, #tpu.memory_space<vmem>>, vector<1x4x4xf32>
    %45 = vector.shape_cast %44 : vector<1x4x4xf32> to vector<4x4xf32>
    %cst_29 = arith.constant dense<0.000000e+00> : vector<4x256xf32>
    %46 = tpu.matmul %45, %43, %cst_29 {dimension_numbers = #tpu.dot_dimension_numbers<[1], [0], [0], [1], [0, 0, 1, 1], [], []>} : vector<4x4xf32>, vector<4x256xf32>, vector<4x256xf32> -> vector<4x256xf32>
    %47 = arith.addf %35, %46 : vector<4x256xf32>
    %c1_i32_30 = arith.constant 1 : i32
    %48 = tpu.dynamic_rotate %10 by %c1_i32_30 dim 1 : vector<4x256xf32>, i32 -> vector<4x256xf32>
    %c1_i32_31 = arith.constant 1 : i32
    %49 = vector.broadcast %c1_i32_31 : i32 to vector<4x256xi32>
    %50 = arith.cmpi sge, %13, %49 : vector<4x256xi32>
    %cst_32 = arith.constant 0.000000e+00 : f32
    %51 = vector.broadcast %cst_32 : f32 to vector<4x256xf32>
    %52 = arith.select %50, %48, %51 : vector<4x256xi1>, vector<4x256xf32>
    %c3 = arith.constant 3 : index
    %c0_33 = arith.constant 0 : index
    %c0_34 = arith.constant 0 : index
    %53 = vector.load %arg3[%c3, %c0_33, %c0_34] : memref<9x4x4xf32, #tpu.memory_space<vmem>>, vector<1x4x4xf32>
    %54 = vector.shape_cast %53 : vector<1x4x4xf32> to vector<4x4xf32>
    %cst_35 = arith.constant dense<0.000000e+00> : vector<4x256xf32>
    %55 = tpu.matmul %54, %52, %cst_35 {dimension_numbers = #tpu.dot_dimension_numbers<[1], [0], [0], [1], [0, 0, 1, 1], [], []>} : vector<4x4xf32>, vector<4x256xf32>, vector<4x256xf32> -> vector<4x256xf32>
    %56 = arith.addf %47, %55 : vector<4x256xf32>
    %c4 = arith.constant 4 : index
    %c0_36 = arith.constant 0 : index
    %c0_37 = arith.constant 0 : index
    %57 = vector.load %arg3[%c4, %c0_36, %c0_37] : memref<9x4x4xf32, #tpu.memory_space<vmem>>, vector<1x4x4xf32>
    %58 = vector.shape_cast %57 : vector<1x4x4xf32> to vector<4x4xf32>
    %cst_38 = arith.constant dense<0.000000e+00> : vector<4x256xf32>
    %59 = tpu.matmul %58, %10, %cst_38 {dimension_numbers = #tpu.dot_dimension_numbers<[1], [0], [0], [1], [0, 0, 1, 1], [], []>} : vector<4x4xf32>, vector<4x256xf32>, vector<4x256xf32> -> vector<4x256xf32>
    %60 = arith.addf %56, %59 : vector<4x256xf32>
    %c255_i32 = arith.constant 255 : i32
    %61 = tpu.dynamic_rotate %10 by %c255_i32 dim 1 : vector<4x256xf32>, i32 -> vector<4x256xf32>
    %c15_i32_39 = arith.constant 15 : i32
    %62 = vector.broadcast %c15_i32_39 : i32 to vector<4x256xi32>
    %63 = arith.cmpi slt, %13, %62 : vector<4x256xi32>
    %cst_40 = arith.constant 0.000000e+00 : f32
    %64 = vector.broadcast %cst_40 : f32 to vector<4x256xf32>
    %65 = arith.select %63, %61, %64 : vector<4x256xi1>, vector<4x256xf32>
    %c5 = arith.constant 5 : index
    %c0_41 = arith.constant 0 : index
    %c0_42 = arith.constant 0 : index
    %66 = vector.load %arg3[%c5, %c0_41, %c0_42] : memref<9x4x4xf32, #tpu.memory_space<vmem>>, vector<1x4x4xf32>
    %67 = vector.shape_cast %66 : vector<1x4x4xf32> to vector<4x4xf32>
    %cst_43 = arith.constant dense<0.000000e+00> : vector<4x256xf32>
    %68 = tpu.matmul %67, %65, %cst_43 {dimension_numbers = #tpu.dot_dimension_numbers<[1], [0], [0], [1], [0, 0, 1, 1], [], []>} : vector<4x4xf32>, vector<4x256xf32>, vector<4x256xf32> -> vector<4x256xf32>
    %69 = arith.addf %60, %68 : vector<4x256xf32>
    %c241_i32 = arith.constant 241 : i32
    %70 = tpu.dynamic_rotate %10 by %c241_i32 dim 1 : vector<4x256xf32>, i32 -> vector<4x256xf32>
    %c240_i32 = arith.constant 240 : i32
    %71 = vector.broadcast %c240_i32 : i32 to vector<4x256xi32>
    %72 = arith.cmpi slt, %11, %71 : vector<4x256xi32>
    %c1_i32_44 = arith.constant 1 : i32
    %73 = vector.broadcast %c1_i32_44 : i32 to vector<4x256xi32>
    %74 = arith.cmpi sge, %13, %73 : vector<4x256xi32>
    %75 = arith.andi %72, %74 : vector<4x256xi1>
    %cst_45 = arith.constant 0.000000e+00 : f32
    %76 = vector.broadcast %cst_45 : f32 to vector<4x256xf32>
    %77 = arith.select %75, %70, %76 : vector<4x256xi1>, vector<4x256xf32>
    %c6 = arith.constant 6 : index
    %c0_46 = arith.constant 0 : index
    %c0_47 = arith.constant 0 : index
    %78 = vector.load %arg3[%c6, %c0_46, %c0_47] : memref<9x4x4xf32, #tpu.memory_space<vmem>>, vector<1x4x4xf32>
    %79 = vector.shape_cast %78 : vector<1x4x4xf32> to vector<4x4xf32>
    %cst_48 = arith.constant dense<0.000000e+00> : vector<4x256xf32>
    %80 = tpu.matmul %79, %77, %cst_48 {dimension_numbers = #tpu.dot_dimension_numbers<[1], [0], [0], [1], [0, 0, 1, 1], [], []>} : vector<4x4xf32>, vector<4x256xf32>, vector<4x256xf32> -> vector<4x256xf32>
    %81 = arith.addf %69, %80 : vector<4x256xf32>
    %c240_i32_49 = arith.constant 240 : i32
    %82 = tpu.dynamic_rotate %10 by %c240_i32_49 dim 1 : vector<4x256xf32>, i32 -> vector<4x256xf32>
    %c240_i32_50 = arith.constant 240 : i32
    %83 = vector.broadcast %c240_i32_50 : i32 to vector<4x256xi32>
    %84 = arith.cmpi slt, %11, %83 : vector<4x256xi32>
    %cst_51 = arith.constant 0.000000e+00 : f32
    %85 = vector.broadcast %cst_51 : f32 to vector<4x256xf32>
    %86 = arith.select %84, %82, %85 : vector<4x256xi1>, vector<4x256xf32>
    %c7 = arith.constant 7 : index
    %c0_52 = arith.constant 0 : index
    %c0_53 = arith.constant 0 : index
    %87 = vector.load %arg3[%c7, %c0_52, %c0_53] : memref<9x4x4xf32, #tpu.memory_space<vmem>>, vector<1x4x4xf32>
    %88 = vector.shape_cast %87 : vector<1x4x4xf32> to vector<4x4xf32>
    %cst_54 = arith.constant dense<0.000000e+00> : vector<4x256xf32>
    %89 = tpu.matmul %88, %86, %cst_54 {dimension_numbers = #tpu.dot_dimension_numbers<[1], [0], [0], [1], [0, 0, 1, 1], [], []>} : vector<4x4xf32>, vector<4x256xf32>, vector<4x256xf32> -> vector<4x256xf32>
    %90 = arith.addf %81, %89 : vector<4x256xf32>
    %c239_i32 = arith.constant 239 : i32
    %91 = tpu.dynamic_rotate %10 by %c239_i32 dim 1 : vector<4x256xf32>, i32 -> vector<4x256xf32>
    %c240_i32_55 = arith.constant 240 : i32
    %92 = vector.broadcast %c240_i32_55 : i32 to vector<4x256xi32>
    %93 = arith.cmpi slt, %11, %92 : vector<4x256xi32>
    %c15_i32_56 = arith.constant 15 : i32
    %94 = vector.broadcast %c15_i32_56 : i32 to vector<4x256xi32>
    %95 = arith.cmpi slt, %13, %94 : vector<4x256xi32>
    %96 = arith.andi %93, %95 : vector<4x256xi1>
    %cst_57 = arith.constant 0.000000e+00 : f32
    %97 = vector.broadcast %cst_57 : f32 to vector<4x256xf32>
    %98 = arith.select %96, %91, %97 : vector<4x256xi1>, vector<4x256xf32>
    %c8 = arith.constant 8 : index
    %c0_58 = arith.constant 0 : index
    %c0_59 = arith.constant 0 : index
    %99 = vector.load %arg3[%c8, %c0_58, %c0_59] : memref<9x4x4xf32, #tpu.memory_space<vmem>>, vector<1x4x4xf32>
    %100 = vector.shape_cast %99 : vector<1x4x4xf32> to vector<4x4xf32>
    %cst_60 = arith.constant dense<0.000000e+00> : vector<4x256xf32>
    %101 = tpu.matmul %100, %98, %cst_60 {dimension_numbers = #tpu.dot_dimension_numbers<[1], [0], [0], [1], [0, 0, 1, 1], [], []>} : vector<4x4xf32>, vector<4x256xf32>, vector<4x256xf32> -> vector<4x256xf32>
    %102 = arith.addf %90, %101 : vector<4x256xf32>
    %103 = vector.broadcast %3 : vector<4x1xf32> to vector<4x256xf32>
    %104 = arith.addf %102, %103 : vector<4x256xf32>
    %cst_61 = arith.constant 0.000000e+00 : f32
    %105 = vector.broadcast %cst_61 : f32 to vector<4x256xf32>
    %106 = arith.maximumf %104, %105 : vector<4x256xf32>
    %c0_62 = arith.constant 0 : index
    %c0_63 = arith.constant 0 : index
    %107 = vector.load %arg4[%c0_62, %c0_63] : memref<16x4xf32, #tpu.memory_space<vmem>>, vector<16x4xf32>
    %cst_64 = arith.constant dense<0.000000e+00> : vector<16x256xf32>
    %108 = tpu.matmul %107, %106, %cst_64 {dimension_numbers = #tpu.dot_dimension_numbers<[1], [0], [0], [1], [0, 0, 1, 1], [], []>} : vector<16x4xf32>, vector<4x256xf32>, vector<16x256xf32> -> vector<16x256xf32>
    %109 = vector.broadcast %4 : vector<16x1xf32> to vector<16x256xf32>
    %110 = arith.addf %108, %109 : vector<16x256xf32>
    %c0_65 = arith.constant 0 : index
    %c0_66 = arith.constant 0 : index
    %111 = vector.load %arg6[%c0_65, %c0_66] : memref<16x16xf32, #tpu.memory_space<vmem>>, vector<16x16xf32>
    %cst_67 = arith.constant dense<0.000000e+00> : vector<16x256xf32>
    %112 = tpu.matmul %111, %110, %cst_67 {dimension_numbers = #tpu.dot_dimension_numbers<[1], [0], [0], [1], [0, 0, 1, 1], [], []>} : vector<16x16xf32>, vector<16x256xf32>, vector<16x256xf32> -> vector<16x256xf32>
    %cst_68 = arith.constant dense<0.000000e+00> : vector<16xf32>
    %113 = vector.multi_reduction <add>, %112, %cst_68 [1] : vector<16x256xf32> to vector<16xf32>
    %114 = vector.shape_cast %113 : vector<16xf32> to vector<16x1xf32>
    %cst_69 = arith.constant 3.906250e-03 : f32
    %115 = vector.broadcast %cst_69 : f32 to vector<16x1xf32>
    %116 = arith.mulf %114, %115 : vector<16x1xf32>
    %cst_70 = arith.constant 0.000000e+00 : f32
    %117 = vector.broadcast %cst_70 : f32 to vector<16x1xf32>
    %118 = arith.subf %117, %116 : vector<16x1xf32>
    %119 = math.exp %118 : vector<16x1xf32>
    %cst_71 = arith.constant 1.000000e+00 : f32
    %120 = vector.broadcast %cst_71 : f32 to vector<16x1xf32>
    %121 = arith.addf %120, %119 : vector<16x1xf32>
    %122 = tpu.reciprocal %121 : vector<16x1xf32> -> vector<16x1xf32>
    %123 = vector.broadcast %122 : vector<16x1xf32> to vector<16x256xf32>
    %124 = arith.mulf %110, %123 : vector<16x256xf32>
    %125 = arith.addf %124, %1 : vector<16x256xf32>
    %cst_72 = arith.constant 0.000000e+00 : f32
    %126 = vector.broadcast %cst_72 : f32 to vector<16x256xf32>
    %127 = arith.maximumf %125, %126 : vector<16x256xf32>
    %c0_73 = arith.constant 0 : index
    %c0_74 = arith.constant 0 : index
    %c0_75 = arith.constant 0 : index
    %128 = vector.load %arg7[%c0_73, %c0_74, %c0_75] : memref<1x16x256xf32, #tpu.memory_space<vmem>>, vector<1x16x256xf32>
    %129 = vector.shape_cast %128 : vector<1x16x256xf32> to vector<16x256xf32>
    %130 = vector.shape_cast %127 : vector<16x256xf32> to vector<1x16x256xf32>
    tpu.vector_store %arg7[%c0_73, %c0_74, %c0_75], %130 {strides = array<i32>} : memref<1x16x256xf32, #tpu.memory_space<vmem>>, vector<1x16x256xf32>,
    return
  }
  func.func @transform_0(%arg0: i32) -> (i32, i32, i32) {
    %c0_i32 = arith.constant 0 : i32
    %c0_i32_0 = arith.constant 0 : i32
    %c0_i32_1 = arith.constant 0 : i32
    return %arg0, %c0_i32, %c0_i32_0 : i32, i32, i32
  }
  func.func @transform_1(%arg0: i32) -> (i32, i32) {
    %c0_i32 = arith.constant 0 : i32
    %c0_i32_0 = arith.constant 0 : i32
    %c0_i32_1 = arith.constant 0 : i32
    return %c0_i32, %c0_i32_0 : i32, i32
  }
  func.func @transform_2(%arg0: i32) -> (i32, i32, i32) {
    %c0_i32 = arith.constant 0 : i32
    %c0_i32_0 = arith.constant 0 : i32
    %c0_i32_1 = arith.constant 0 : i32
    %c0_i32_2 = arith.constant 0 : i32
    return %c0_i32, %c0_i32_0, %c0_i32_1 : i32, i32, i32
  }
  func.func @transform_3(%arg0: i32) -> (i32, i32) {
    %c0_i32 = arith.constant 0 : i32
    %c0_i32_0 = arith.constant 0 : i32
    %c0_i32_1 = arith.constant 0 : i32
    return %c0_i32, %c0_i32_0 : i32, i32
  }
  func.func @transform_4(%arg0: i32) -> (i32, i32) {
    %c0_i32 = arith.constant 0 : i32
    %c0_i32_0 = arith.constant 0 : i32
    %c0_i32_1 = arith.constant 0 : i32
    return %c0_i32, %c0_i32_0 : i32, i32
  }
  func.func @transform_5(%arg0: i32) -> (i32, i32) {
    %c0_i32 = arith.constant 0 : i32
    %c0_i32_0 = arith.constant 0 : i32
    %c0_i32_1 = arith.constant 0 : i32
    return %c0_i32, %c0_i32_0 : i32, i32
  }
  func.func @transform_6(%arg0: i32) -> (i32, i32, i32) {
    %c0_i32 = arith.constant 0 : i32
    %c0_i32_0 = arith.constant 0 : i32
    %c0_i32_1 = arith.constant 0 : i32
    return %arg0, %c0_i32, %c0_i32_0 : i32, i32, i32
  }
}

</mosaic_0001>

<bundles_post_ra>
// kernel: tpu_custom_call.1
= control target key start
LH: loop header
LB: loop body
LE: loop exit
PB: predicated region body
PF: predicated region fallthrough
CT: control target
= control target key end

     0   :  { %11 = vsyncpa [#allocation3], 0  ;;  %s2134_s0 = inlined_call_operand.vmem [shape: f32[2,16,256], index: 0, kind: input, shape index: {}]   ;;  %s2135_s1 = inlined_call_operand.hbm [shape: f32[4,16], index: 1, kind: input, shape index: {}]   ;;  %s2136_s2 = inlined_call_operand.vmem [shape: f32[9,4,4], index: 2, kind: input, shape index: {}]   ;;  %s2137_s3 = inlined_call_operand.vmem [shape: f32[16,4], index: 3, kind: input, shape index: {}]   ;;  %s2138_s4 = inlined_call_operand.vmem [shape: f32[16,3], index: 4, kind: input, shape index: {}]   ;;  %s2139_s5 = inlined_call_operand.vmem [shape: f32[16,16], index: 5, kind: input, shape index: {}]   ;;  %s2140_s6 = inlined_call_operand.hbm [shape: f32[2,16,256], index: 6, kind: output, shape index: {}]  }
   0x1   :  { %12 = vsyncpa [#allocation4], 0 }
   0x2   :  { %14 = vsyncpa [#allocation4 + $0x1], 0  ;;  %s1790_s21 = smov 0   ;;  %s1792_s22 = smov 0  }
   0x3   :  { %s1794_s23 = smov 0   ;;  %s1796_s24 = smov 0  }
   0x4 LB: > { %s1811_s25 = sadd.s32 4294967295, %s1738_s24   ;;  %s1515_s26 = sadd.s32 4294967294, %s1738_s24   ;;  %s1738_s24 = sphi %s1796_s24, %s2162_s24   ;;  %s1734_s23 = sphi %s1794_s23, %s2161_s23   ;;  %s1730_s22 = sphi %s1792_s22, %s2160_s22   ;;  %s1726_s21 = sphi %s1790_s21, %s2159_s21  }
   0x5   : > { %s1815_s27 = sadd.s32 1, %s1738_s24   ;;  %s158_s28 = sadd.s32 1, %s1734_s23 }
   0x6   : > { %s155_s29 = ssub.s32 %s1738_s24, %s1815_s27  ;;  %p168_p0 = scmp.ne.s32.totalorder %s1734_s23, %s1730_s22 }
   0x7   : > { %p156_p1 = scmp.eq.s32.totalorder %s155_s29, 0  ;;  %p169_p2 = scmp.eq.s32.totalorder %s1811_s25, 1 }
   0x8   : > { %p174_p3 = scmp.ne.s32.totalorder %s1730_s22, %s1726_s21  ;;  %p175_p4 = scmp.eq.s32.totalorder %s1515_s26, 1 }
   0x9   : > { %s1826_s30 = scalar_select %p156_p1, %s1734_s23, %s158_s28  }
   0xa   : > { %p1828_p5 = por %p169_p2, %p168_p0  ;;  %p1832_p6 = por %p175_p4, %p174_p3 }
   0xb   : > { %p1516_p7 = scmp.ge.s32.totalorder %s1738_s24, 1  ;;  %p182_p8 = scmp.lt.s32.totalorder %s1738_s24, 3 }
   0xc   : > { %s2142_s8 = scalar_select %p1832_p6, 1, 0 }
   0xd   : > { %p1587_p9 = scmp.eq.s32.totalorder %s1811_s25, 0  ;;  %p1839_p10 = pnand %p1516_p7, %p182_p8 }
   0xe   : > { %s1740_s10 = smov [#allocation2]  }
   0xf   : > { %s195_s11 = sshll.u32 %s1740_s10, 4  ;;  %p1579_p11 = pneg %p1839_p10  ;;  %s196_s11 = int_to_ptr.vmem [resolvable:$true] %s195_s11 }
  0x10   : > { %s1659_s12 = scalar_lea.vmem %s196_s11, 64  ;;  %p1667_p3 = scmp.lt.s32.totalorder %s196_s11, %s196_s11 }
  0x11   : > { %p1580_p12 = pnand %p1587_p9, %p1579_p11  ;;  %p1660_p0 = scmp.ne.s32.totalorder %s196_s11, %s1659_s12 }
  0x12   : > { %p1668_p4 = scmp.lt.s32.totalorder %s1659_s12, %s1659_s12 }
  0x13   : > { %p1650_p13 = pneg %p1580_p12 }
  0x14   : > { %p1669_p6 = por %p1668_p4, %p1667_p3 }
  0x15   : > { %p1662_p1 = pnand %p1660_p0, %p1650_p13 }
  0x17   : > { %p1663_p2 = pneg %p1662_p1 }
  0x19   : > { %p1670_p7 = pnand %p1669_p6, %p1663_p2 }
  0x1b   : > { %1673 = shalt.err (!%p1670_p7)
}
  0x1c   : > { %1582 = dma.hbm_to_vmem [thread:$0]  (!%p1580_p12), %s2135_s1, 64, %s196_s11, [#allocation3]  }
  0x1d   : > { %228 = sbr.rel (%p1839_p10) target bundleno = 1193 (0x4a9), region = 44 }
  0x22   : > { %1717 = dma.done.wait (%p1587_p9), [#allocation3], 64  }
  0x23   : > { %1719 = vsyncadd (%p1587_p9), [#allocation3], 4294967232  ;;  %p258_p8 = scmp.lt.s32.totalorder %s1811_s25, 1  ;;  %v1741_v0 = vmov 0.0   ;;  %v1742_v1 = vmov 0   ;;  %vm276_vm0 = vcmask 130048   ;;  %v353_v16 = vlaneseq }
  0x24   : > { %344 = vmatprep.mubr.f32.mxu0 %v1741_v0  ;;  %1636 = vset.pattern.permute.xlu0 %v1742_v1  ;;  %v267_v6 = vld [vmem:[%s2138_s4] sm:$0xf]  ;;  %s1743_s28 = smov 17   ;;  %s1744_s29 = smov 16   ;;  %v1749_v15 = vmov 1   ;;  %vm389_vm9 = vcmask 1043456  }
  0x25   : > { %s259_s15 = scalar_select %p258_p8, %s1811_s25, 1  ;;  %460 = vmatprep.mubr.f32.mxu1 %v1741_v0  ;;  %v270_v7 = vld [vmem:[#allocation2] sm:$0xf]  ;;  %273 = vperm.xlu0 %1636, %v267_v6   ;;  %v1902_v17 = vand.u32 127, %v353_v16  ;;  %vm385_vm11 = vcmask 31744   ;;  %v269_v25 = vld [vmem:[%s2138_s4 + $0x8] sm:$0xff] }
  0x26   : > { %s1745_s9 = smov 15   ;;  %s1746_s10 = smov 1   ;;  %1637 = vset.pattern.permute.xlu1 %v1749_v15  ;;  %v1525_v39 = vld [vmem:[%s2136_s2 + $0x4] sm:$0xf]  ;;  %v1532_v44 = vld [vmem:[%s2136_s2 + $0x8] sm:$0xf] }
  0x27   : > { %s1571_s16 = sshll.u32 %s259_s15, 5  ;;  %s1747_s11 = smov 127   ;;  %v1905_v20 = vadd.s32 128, %v1902_v17  ;;  %v356_v21 = vand.u32 15, %v1902_v17  ;;  %vm362_vm2 = vcmp.lt.s32.totalorder %v1902_v17, 17  ;;  %vm365_vm3 = vcmp.ge.s32.totalorder %v1902_v17, 16 }
  0x28   : > { %s262_s19 = scalar_lea.vmem %s2134_s0, %s1571_s16  ;;  %s1748_s12 = smov 113   ;;  %vm378_vm5 = vcmp.lt.s32.totalorder %v1902_v17, 16  ;;  %vm551_vm6 = vcmp.lt.s32.totalorder %v1902_v17, 15  ;;  %vm648_vm13 = vcmp.lt.s32.totalorder %v1902_v17, 1  ;;  %v373_v50 = vld [vmem:[%s2136_s2] sm:$0xf] }
  0x29   : > { %v1863_v2 = vld [vmem:[%s262_s19 + $0x18] sm:$0xff]  ;;  %v1865_v3 = vld [vmem:[%s262_s19 + $0x10] sm:$0xff]  ;;  %v1867_v4 = vld [vmem:[%s262_s19 + $0x8] sm:$0xff]  ;;  %s1750_s13 = smov 112   ;;  %s1751_s14 = smov 111   ;;  %v357_v23 = vand.u32 15, %v1905_v20 }
  0x2a   : > { %308 = vmatprep.subr.mxu0 %v1863_v2  ;;  %v1870_v5 = vld [vmem:[%s262_s19] sm:$0xff]  ;;  %vm1909_vm1 = vcmp.lt.s32.totalorder %v356_v21, 15  ;;  %vm1915_vm4 = vcmp.ge.s32.totalorder %v356_v21, 1  ;;  %vm825_vm14 = vcmp.lt.s32.totalorder %v1902_v17, 127  ;;  %vm922_vm15 = vcmp.lt.s32.totalorder %v1905_v20, 240  ;;  %s255_s17 = sand.u32 1, %s1730_s22  }
  0x2b   : > { %309 = vmatpush1.msra.mxu0 %v1865_v3  ;;  %vm1921_vm7 = vcmp.lt.s32.totalorder %v357_v23, 15  ;;  %vm1929_vm8 = vmand %vm365_vm3, %vm1909_vm1  ;;  %vm1933_vm10 = vcmp.ge.s32.totalorder %v357_v23, 1  ;;  %v1540_v55 = vld [vmem:[%s2136_s2 + $0x10] sm:$0xf]  ;;  %v1536_v58 = vld [vmem:[%s2136_s2 + $0xc] sm:$0xf] }
  0x2c   : > { %310 = vmatprep.subr.mxu0 %v1867_v4  ;;  %vm1941_vm12 = vmand %vm365_vm3, %vm1915_vm4  ;;  %v1552_v15 = vld [vmem:[%s2136_s2 + $0x1c] sm:$0xf]  ;;  %v268_v20 = vld [vmem:[%s2138_s4] sm:$0xff]  ;;  %v1752_v26 = vmov 2   ;;  %s1521_s18 = sshll.u32 %s255_s17, 5  ;;  %s1572_s19 = sshll.u32 %s1811_s25, 9 }
  0x2d   : > { %311 = vmatpush1.msra.mxu0 %v1870_v5  ;;  %1638 = vset.pattern.permute.xlu0 %v1752_v26  ;;  %s257_s20 = scalar_lea.vmem [#allocation5], %s1521_s18  ;;  %s2093_s25 = scalar_lea.sflag [#allocation4], %s255_s17 }
  0x2e   : > { %1524 = vmatmul.mubr.msk.f32.vlgmr.msra.gmra.mxu0 %vm276_vm0, %v270_v7  ;;  %v1544_v7 = vld [vmem:[%s2136_s2 + $0x14] sm:$0xf]  ;;  %s1441_s26 = sshll.u32 %s257_s20, 4  ;;  %s2091_s26 = int_to_ptr.vmem [resolvable:$true] %s1441_s26 }
  0x2f   : > { %635 = vmatprep.mubr.f32.mxu0 %v1741_v0 }
  0xa0   : > { %v274_v8 = vpop.permute.xlu0 %273 }
  0xee   : > { %v346_v9 = vpop.f32.mrf.mxu0 }
  0xef   : > { %v347_v10 = vadd.f32 %v346_v9, %v274_v8 }
  0xf0   : > { %v348_v11 = vpop.f32.mrf.mxu0 }
  0xf1   : > { %v1880_v12 = vmax.f32 %v347_v10, 0.0  ;;  %v349_v13 = vadd.f32 %v348_v11, %v274_v8  ;;  %v1548_v10 = vld [vmem:[%s2136_s2 + $0x18] sm:$0xf] }
  0xf3   : > { %358 = vrot.lane.b32.xlu1 %v1880_v12, %s1743_s28  ;;  %374 = vrot.lane.b32.xlu0 %v1880_v12, %s1744_s29  ;;  %v1885_v14 = vmax.f32 %v349_v13, 0.0 }
  0xf7   : > { %547 = vrot.lane.b32.xlu1 %v1880_v12, %s1745_s9  ;;  %360 = vrot.lane.b32.xlu0 %v1885_v14, %s1743_s28 }
  0xfb   : > { %376 = vrot.lane.b32.xlu1 %v1885_v14, %s1744_s29  ;;  %549 = vrot.lane.b32.xlu0 %v1885_v14, %s1745_s9 }
  0xff   : > { %644 = vrot.lane.b32.xlu1 %v1880_v12, %s1746_s10  ;;  %646 = vrot.lane.b32.xlu0 %v1885_v14, %s1746_s10  ;;  %s2089_s10 = scalar_lea.hbm %s2140_s6, %s1572_s19 }
 0x103   : > { %821 = vrot.lane.b32.xlu1 %v1880_v12, %s1747_s11  ;;  %823 = vrot.lane.b32.xlu0 %v1885_v14, %s1747_s11  ;;  %s1674_s11 = scalar_lea.vmem %s2091_s26, 512 }
 0x104   : > { %p1675_p6 = scmp.ne.s32.totalorder %s2091_s26, %s1674_s11 }
 0x106   : > { %p1676_p9 = pnand %p1675_p6, %p1828_p5 }
 0x107   : > { %914 = vrot.lane.b32.xlu1 %v1880_v12, %s1748_s12  ;;  %916 = vrot.lane.b32.xlu0 %v1885_v14, %s1748_s12  ;;  %s1753_s12 = smov [#allocation5]  }
 0x108   : > { %p1677_p10 = pneg %p1676_p9 }
 0x10b   : > { %1011 = vrot.lane.b32.xlu1 %v1880_v12, %s1750_s13  ;;  %1013 = vrot.lane.b32.xlu0 %v1885_v14, %s1750_s13  ;;  %s1678_s13 = sshll.u32 %s1753_s12, 4  ;;  %s1679_s13 = int_to_ptr.vmem [resolvable:$false] %s1678_s13 }
 0x10c   : > { %p1681_p11 = scmp.lt.s32.totalorder %s2091_s26, %s1679_s13 }
 0x10f   : > { %1104 = vrot.lane.b32.xlu1 %v1880_v12, %s1751_s14  ;;  %1106 = vrot.lane.b32.xlu0 %v1885_v14, %s1751_s14  ;;  %s1680_s14 = scalar_lea.vmem %s1679_s13, 1024 }
 0x110   : > { %p1682_p12 = scmp.lt.s32.totalorder %s1680_s14, %s1674_s11 }
 0x112   : > { %p1683_p13 = por %p1682_p12, %p1681_p11 }
 0x113   : > { %1200 = vperm.xlu1 %1637, %v267_v6   ;;  %1216 = vperm.xlu0 %1638, %v269_v25  }
 0x114   : > { %p1684_p0 = pnand %p1683_p13, %p1677_p10 }
 0x117   : > { %1639 = vset.pattern.permute.xlu1 %v1752_v26 }
 0x118   : > { %1211 = vperm.xlu1 %1639, %v268_v20  }
 0x165   : > { %v359_v18 = vpop.permute.xlu1 %358  ;;  %v375_v19 = vpop.permute.xlu0 %374 }
 0x169   : > { %v548_v22 = vpop.permute.xlu1 %547  ;;  %v361_v24 = vpop.permute.xlu0 %360 }
 0x16a   : > { %v363_v30 = vsel %vm362_vm2, %v359_v18, %v361_v24  ;;  %v364_v31 = vsel %vm362_vm2, %v361_v24, %v359_v18  ;;  %vm918_vm2 = vcmp.lt.s32.totalorder %v1902_v17, 113  ;;  %v1556_v24 = vld [vmem:[%s2136_s2 + $0x20] sm:$0xf] }
 0x16b   : > { %v372_v43 = vsel %vm1933_vm10, %v363_v30, 0.0  ;;  %v371_v45 = vsel %vm1941_vm12, %v364_v31, 0.0 }
 0x16d   : > { %v377_v32 = vpop.permute.xlu1 %376  ;;  %v550_v33 = vpop.permute.xlu0 %549 }
 0x16e   : > { %v380_v35 = vsel %vm378_vm5, %v377_v32, %v375_v19  ;;  %v552_v36 = vsel %vm551_vm6, %v548_v22, %v550_v33  ;;  %v553_v37 = vsel %vm551_vm6, %v550_v33, %v548_v22  ;;  %v379_v38 = vsel %vm378_vm5, %v375_v19, %v377_v32  ;;  %vm1112_vm6 = vmand %vm922_vm15, %vm1921_vm7 }
 0x16f   : > { %v558_v40 = vsel %vm1929_vm8, %v553_v37, 0.0  ;;  %v559_v41 = vsel %vm1921_vm7, %v552_v36, 0.0  ;;  %1526 = vmatprep.subr.msk.mxu1 %vm389_vm9, %v379_v38  ;;  %v381_v42 = vsel %vm365_vm3, %v380_v35, 0.0  ;;  %vm2005_vm3 = vmand %vm922_vm15, %vm1933_vm10  ;;  %vm1015_vm5 = vcmp.lt.s32.totalorder %v1902_v17, 112 }
 0x170   : > { %1527 = vmatpush1.msk.msra.mxu1 %vm389_vm9, %v381_v42  ;;  %1533 = vmatprep.subr.msk.mxu0 %vm389_vm9, %v559_v41 }
 0x171   : > { %v645_v46 = vpop.permute.xlu1 %644  ;;  %1528 = vmatmul.mubr.msk.f32.vlgmr.msra.gmra.mxu1 %vm385_vm11, %v1525_v39  ;;  %1529 = vmatprep.subr.msk.mxu1 %vm389_vm9, %v372_v43  ;;  %v647_v47 = vpop.permute.xlu0 %646 }
 0x172   : > { %1534 = vmatpush1.msk.msra.mxu0 %vm389_vm9, %v558_v40  ;;  %v649_v48 = vsel %vm648_vm13, %v645_v46, %v647_v47  ;;  %v650_v49 = vsel %vm648_vm13, %v647_v47, %v645_v46  ;;  %1530 = vmatpush1.msk.msra.mxu1 %vm389_vm9, %v371_v45 }
 0x173   : > { %v651_v51 = vsel %vm1915_vm4, %v650_v49, 0.0  ;;  %v652_v52 = vsel %vm1933_vm10, %v649_v48, 0.0  ;;  %1541 = vmatprep.subr.msk.mxu0 %vm389_vm9, %v1885_v14  ;;  %1535 = vmatmul.mubr.msk.f32.vlgmr.msra.gmra.mxu0 %vm385_vm11, %v1532_v44 }
 0x174   : > { %1542 = vmatpush1.msk.msra.mxu0 %vm389_vm9, %v1880_v12  ;;  %540 = vmatprep.mubr.f32.mxu1 %v1741_v0 }
 0x175   : > { %1537 = vmatprep.subr.msk.mxu1 %vm389_vm9, %v652_v52  ;;  %v822_v53 = vpop.permute.xlu1 %821  ;;  %1531 = vmatmul.mubr.msk.f32.vlgmr.msra.gmra.mxu1 %vm385_vm11, %v373_v50  ;;  %v824_v54 = vpop.permute.xlu0 %823 }
 0x176   : > { %1538 = vmatpush1.msk.msra.mxu1 %vm389_vm9, %v651_v51  ;;  %v826_v56 = vsel %vm825_vm14, %v822_v53, %v824_v54  ;;  %v827_v57 = vsel %vm825_vm14, %v824_v54, %v822_v53  ;;  %728 = vmatprep.mubr.f32.mxu1 %v1741_v0 }
 0x177   : > { %v828_v59 = vsel %vm1909_vm1, %v826_v56, 0.0  ;;  %v829_v60 = vsel %vm1921_vm7, %v827_v57, 0.0  ;;  %812 = vmatprep.mubr.f32.mxu0 %v1741_v0 }
 0x178   : > { %1545 = vmatprep.subr.msk.mxu1 %vm389_vm9, %v829_v60  ;;  %1543 = vmatmul.mubr.msk.f32.vlgmr.msra.gmra.mxu0 %vm385_vm11, %v1540_v55 }
 0x179   : > { %v915_v62 = vpop.permute.xlu1 %914  ;;  %1539 = vmatmul.mubr.msk.f32.vlgmr.msra.gmra.mxu1 %vm385_vm11, %v1536_v58  ;;  %v917_v63 = vpop.permute.xlu0 %916  ;;  %1002 = vmatprep.mubr.f32.mxu0 %v1741_v0 }
 0x17a   : > { %1546 = vmatpush1.msk.msra.mxu1 %vm389_vm9, %v828_v59  ;;  %v919_v1 = vsel %vm918_vm2, %v915_v62, %v917_v63  ;;  %v920_v6 = vsel %vm918_vm2, %v917_v63, %v915_v62  ;;  %905 = vmatprep.mubr.f32.mxu1 %v1741_v0 }
 0x17b   : > { %v925_v8 = vsel %vm1915_vm4, %v919_v1, 0.0  ;;  %v926_v9 = vsel %vm2005_vm3, %v920_v6, 0.0  ;;  %vm1108_vm4 = vcmp.lt.s32.totalorder %v1902_v17, 111 }
 0x17c   : > { %1549 = vmatprep.subr.msk.mxu0 %vm389_vm9, %v926_v9 }
 0x17d   : > { %v1012_v11 = vpop.permute.xlu1 %1011  ;;  %1547 = vmatmul.mubr.msk.f32.vlgmr.msra.gmra.mxu1 %vm385_vm11, %v1544_v7  ;;  %1550 = vmatpush1.msk.msra.mxu0 %vm389_vm9, %v925_v8  ;;  %v1014_v12 = vpop.permute.xlu0 %1013  ;;  %v1207_v7 = vld [vmem:[%s2137_s3] sm:$0xff]  ;;  %v1208_v8 = vld [vmem:[%s2137_s3 + $0x8] sm:$0xff] }
 0x17e   : > { %v1017_v13 = vsel %vm1015_vm5, %v1014_v12, %v1012_v11  ;;  %1551 = vmatmul.mubr.msk.f32.vlgmr.msra.gmra.mxu0 %vm385_vm11, %v1548_v10  ;;  %1095 = vmatprep.mubr.f32.mxu1 %v1741_v0  ;;  %v1016_v16 = vsel %vm1015_vm5, %v1012_v11, %v1014_v12 }
 0x17f   : > { %v1019_v14 = vsel %vm922_vm15, %v1017_v13, 0.0  ;;  %1190 = vmatprep.mubr.f32.mxu0 %v1741_v0 }
 0x180   : > { %1553 = vmatprep.subr.msk.mxu1 %vm389_vm9, %v1019_v14 }
 0x181   : > { %v1105_v18 = vpop.permute.xlu1 %1104  ;;  %1554 = vmatpush1.msk.msra.mxu1 %vm389_vm9, %v1016_v16  ;;  %v1107_v19 = vpop.permute.xlu0 %1106 }
 0x182   : > { %v1109_v21 = vsel %vm1108_vm4, %v1105_v18, %v1107_v19  ;;  %v1110_v17 = vsel %vm1108_vm4, %v1107_v19, %v1105_v18  ;;  %1555 = vmatmul.mubr.msk.f32.vlgmr.msra.gmra.mxu1 %vm385_vm11, %v1552_v15 }
 0x183   : > { %v1113_v22 = vsel %vm1909_vm1, %v1109_v21, 0.0  ;;  %v1114_v23 = vsel %vm1112_vm6, %v1110_v17, 0.0  ;;  %1295 = vmatprep.mubr.f32.mxu1 %v1741_v0  ;;  %v1308_v21 = vld [vmem:[%s2139_s5] sm:$0xff]  ;;  %v1309_v17 = vld [vmem:[%s2139_s5 + $0x8] sm:$0xff] }
 0x184   : > { %1557 = vmatprep.subr.msk.mxu0 %vm389_vm9, %v1114_v23 }
 0x185   : > { %1558 = vmatpush1.msk.msra.mxu0 %vm389_vm9, %v1113_v22 }
 0x186   : > { %1559 = vmatmul.mubr.msk.f32.vlgmr.msra.gmra.mxu0 %vm385_vm11, %v1556_v24 }
 0x187   : > { %1380 = vmatprep.mubr.f32.mxu0 %v1741_v0 }
 0x18e   : > { %v1201_v59 = vpop.permute.xlu1 %1200  ;;  %v1217_v12 = vpop.permute.xlu0 %1216 }
 0x193   : > { %v1212_v14 = vpop.permute.xlu1 %1211 }
 0x231   : > { %v462_v27 = vpop.f32.mrf.mxu1 }
 0x233   : > { %v464_v28 = vpop.f32.mrf.mxu1  ;;  %v637_v29 = vpop.f32.mrf.mxu0 }
 0x235   : > { %v542_v30 = vpop.f32.mrf.mxu1  ;;  %v639_v31 = vpop.f32.mrf.mxu0 }
 0x236   : > { %v543_v32 = vadd.f32 %v542_v30, %v462_v27 }
 0x237   : > { %v544_v33 = vpop.f32.mrf.mxu1 }
 0x238   : > { %v545_v34 = vadd.f32 %v544_v33, %v464_v28  ;;  %v642_v35 = vadd.f32 %v637_v29, %v543_v32  ;;  %v814_v36 = vpop.f32.mrf.mxu0 }
 0x239   : > { %v730_v37 = vpop.f32.mrf.mxu1 }
 0x23a   : > { %v643_v38 = vadd.f32 %v639_v31, %v545_v34  ;;  %v735_v39 = vadd.f32 %v730_v37, %v642_v35  ;;  %v816_v40 = vpop.f32.mrf.mxu0 }
 0x23b   : > { %v732_v41 = vpop.f32.mrf.mxu1 }
 0x23c   : > { %v736_v42 = vadd.f32 %v732_v41, %v643_v38  ;;  %v819_v43 = vadd.f32 %v814_v36, %v735_v39 }
 0x23d   : > { %v907_v44 = vpop.f32.mrf.mxu1 }
 0x23e   : > { %v820_v45 = vadd.f32 %v816_v40, %v736_v42  ;;  %v912_v46 = vadd.f32 %v907_v44, %v819_v43  ;;  %v1004_v47 = vpop.f32.mrf.mxu0 }
 0x23f   : > { %v909_v48 = vpop.f32.mrf.mxu1 }
 0x240   : > { %v913_v49 = vadd.f32 %v909_v48, %v820_v45  ;;  %v1006_v50 = vpop.f32.mrf.mxu0  ;;  %v1009_v51 = vadd.f32 %v1004_v47, %v912_v46 }
 0x242   : > { %v1097_v52 = vpop.f32.mrf.mxu1  ;;  %v1010_v53 = vadd.f32 %v1006_v50, %v913_v49 }
 0x243   : > { %v1102_v55 = vadd.f32 %v1097_v52, %v1009_v51 }
 0x244   : > { %v1099_v54 = vpop.f32.mrf.mxu1 }
 0x245   : > { %v1103_v57 = vadd.f32 %v1099_v54, %v1010_v53 }
 0x246   : > { %v1192_v56 = vpop.f32.mrf.mxu0 }
 0x247   : > { %v1197_v58 = vadd.f32 %v1192_v56, %v1102_v55 }
 0x248   : > { %v1194_v60 = vpop.f32.mrf.mxu0 }
 0x249   : > { %v1198_v61 = vadd.f32 %v1194_v60, %v1103_v57  ;;  %v1203_v62 = vadd.f32 %v1201_v59, %v1197_v58 }
 0x24b   : > { %v1204_v63 = vadd.f32 %v1201_v59, %v1198_v61  ;;  %v1205_v6 = vmax.f32 %v1203_v62, 0.0 }
 0x24d   : > { %v1206_v1 = vmax.f32 %v1204_v63, 0.0 }
 0x24f   : > { %1560 = vmatprep.subr.msk.mxu1 %vm389_vm9, %v1206_v1 }
 0x250   : > { %1561 = vmatpush1.msk.msra.mxu1 %vm389_vm9, %v1205_v6 }
 0x251   : > { %1562 = vmatmul.mubr.msk.f32.vlgmr.msra.gmra.mxu1 %vm385_vm11, %v1207_v7 }
 0x252   : > { %1301 = vmatprep.mubr.f32.mxu1 %v1741_v0 }
 0x255   : > { %1563 = vmatmul.mubr.msk.f32.gmra.mxu1 %vm385_vm11, %v1208_v8 }
 0x311   : > { %v1297_v9 = vpop.f32.mrf.mxu1 }
 0x312   : > { %v1298_v19 = vadd.f32 %v1297_v9, %v1212_v14 }
 0x313   : > { %v1299_v10 = vpop.f32.mrf.mxu1 }
 0x314   : > { %v1300_v18 = vadd.f32 %v1299_v10, %v1212_v14 }
 0x315   : > { %v1303_v11 = vpop.f32.mrf.mxu1 }
 0x316   : > { %v1304_v16 = vadd.f32 %v1303_v11, %v1217_v12 }
 0x317   : > { %v1305_v13 = vpop.f32.mrf.mxu1 }
 0x318   : > { %v1306_v15 = vadd.f32 %v1305_v13, %v1217_v12 }
 0x31a   : > { %1344 = vmatprep.subr.mxu0 %v1306_v15 }
 0x31b   : > { %1345 = vmatpush1.msra.mxu0 %v1304_v16 }
 0x31c   : > { %1346 = vmatprep.subr.mxu0 %v1300_v18 }
 0x31d   : > { %1347 = vmatpush1.msra.mxu0 %v1298_v19 }
 0x31e   : > { %1564 = vmatmul.mubr.msk.f32.vlgmr.msra.gmra.mxu0 %vm276_vm0, %v1308_v21 }
 0x31f   : > { %1386 = vmatprep.mubr.f32.mxu0 %v1741_v0 }
 0x322   : > { %1565 = vmatmul.mubr.msk.f32.gmra.mxu0 %vm276_vm0, %v1309_v17 }
 0x3de   : > { %v1382_v22 = vpop.f32.mrf.mxu0 }
 0x3e0   : > { %v1384_v23 = vpop.f32.mrf.mxu0 }
 0x3e1   : > { %v1393_v24 = vadd.f32 %v1384_v23, %v1382_v22 }
 0x3e2   : > { %v1388_v20 = vpop.f32.mrf.mxu0 }
 0x3e3   : > { %1394 = vadd.xlane.f32.xlu1 %v1393_v24 }
 0x3e4   : > { %v1390_v25 = vpop.f32.mrf.mxu0 }
 0x3e5   : > { %v1396_v26 = vadd.f32 %v1390_v25, %v1388_v20 }
 0x3e7   : > { %1397 = vadd.xlane.f32.xlu0 %v1396_v26 }
 0x46c   : > { %v1395_v27 = vpop.xlane.xlu1 %1394 }
 0x46d   : > { %v1399_v28 = vmul.f32 0.00390625, %v1395_v27 }
 0x46f   : > { %v1401_v29 = vsub.f32 0.0, %v1399_v28 }
 0x470   : > { %v1398_v30 = vpop.xlane.xlu0 %1397 }
 0x471   : > { %v1403_v0 = vmul.f32 1.442695, %v1401_v29  ;;  %v1400_v31 = vmul.f32 0.00390625, %v1398_v30 }
 0x473   : > { %1640 = vpow2.f32 %v1403_v0  ;;  %v1402_v32 = vsub.f32 0.0, %v1400_v31 }
 0x475   : > { %v1405_v33 = vmul.f32 1.442695, %v1402_v32 }
 0x477   : > { %1642 = vpow2.f32 %v1405_v33 }
 0x480   : > { %v1641_v34 = vpop.eup %1640 }
 0x481   : > { %v1407_v35 = vadd.f32 1.0, %v1641_v34 }
 0x483   : > { %1644 = vrcp.f32 %v1407_v35 }
 0x484   : > { %v1643_v36 = vpop.eup %1642 }
 0x485   : > { %v1408_v37 = vadd.f32 1.0, %v1643_v36 }
 0x487   : > { %1646 = vrcp.f32 %v1408_v37 }
 0x490   : > { %v1645_v38 = vpop.eup %1644 }
 0x491   : > { %v1411_v39 = vmul.f32 %v1645_v38, %v1298_v19  ;;  %v1412_v40 = vmul.f32 %v1645_v38, %v1300_v18 }
 0x493   : > { %v1415_v41 = vadd.f32 %v1411_v39, %v1870_v5  ;;  %v1416_v42 = vadd.f32 %v1412_v40, %v1867_v4 }
 0x494   : > { %v1647_v43 = vpop.eup %1646 }
 0x495   : > { %v1419_v44 = vmax.f32 %v1415_v41, 0.0  ;;  %v1420_v45 = vmax.f32 %v1416_v42, 0.0  ;;  %v1413_v46 = vmul.f32 %v1647_v43, %v1304_v16  ;;  %v1414_v47 = vmul.f32 %v1647_v43, %v1306_v15 }
 0x497   : > { %v1417_v48 = vadd.f32 %v1413_v46, %v1865_v3  ;;  %v1418_v49 = vadd.f32 %v1414_v47, %v1863_v2  ;;  %1423 = vst [vmem:[%s257_s20] sm:$0xff] %v1419_v44  ;;  %1424 = vst [vmem:[%s257_s20 + $0x8] sm:$0xff] %v1420_v45 }
 0x499   : > { %v1421_v4 = vmax.f32 %v1417_v48, 0.0  ;;  %v1422_v5 = vmax.f32 %v1418_v49, 0.0 }
 0x49b   : > { %1425 = vst [vmem:[%s257_s20 + $0x10] sm:$0xff] %v1421_v4  ;;  %1426 = vst [vmem:[%s257_s20 + $0x18] sm:$0xff] %v1422_v5 }
 0x49c   : > { %1687 = shalt.err (!%p1684_p0)
}
 0x49d   : > { %s1688_s15 = scalar_lea.hbm %s2089_s10, 512  ;;  %s1692_s18 = scalar_lea.hbm %s2140_s6, 1024 }
 0x49e   : > { %p1689_p1 = scmp.ne.s32.totalorder %s2089_s10, %s1688_s15  ;;  %p1693_p4 = scmp.lt.s32.totalorder %s2089_s10, %s2140_s6 }
 0x49f   : > { %p1694_p7 = scmp.lt.s32.totalorder %s1692_s18, %s1688_s15 }
 0x4a0   : > { %p1690_p2 = pnand %p1689_p1, %p1828_p5 }
 0x4a1   : > { %p1695_p8 = por %p1694_p7, %p1693_p4 }
 0x4a2   : > { %p1691_p3 = pneg %p1690_p2 }
 0x4a4   : > { %p1696_p6 = pnand %p1695_p8, %p1691_p3 }
 0x4a6   : > { %1699 = shalt.err (!%p1696_p6)
}
 0x4a7   : > { %s1754_s28 = smov 256  }
 0x4a8   : > { %1577 = dma.vmem_to_hbm [thread:$0]  (%p1828_p5), %s2091_s26, 512, %s2089_s10, %s2093_s25, %s1754_s28, %s1754_s28, %s1744_s29  }
 0x4a9 PF: > { %p1589_p9 = scmp.ge.s32.totalorder %s1738_s24, 2  ;;  %s1456_s9 = sand.u32 1, %s1726_s21  }
 0x4aa   : > { %p2158_p10 = scmp.ne.s32.totalorder %s2142_s8, 0  ;;  %s1457_s11 = scalar_lea.sflag [#allocation4], %s1456_s9 }
 0x4ac   : > { %p1584_p11 = pnand %p1589_p9, %p2158_p10 }
 0x4ae   : > { %p1585_p12 = pneg %p1584_p11 }
 0x4b0   : > { %1721 = dma.done.wait (%p1585_p12), %s1457_s11, 512  }
 0x4b1   : > { %1723 = vsyncadd (%p1585_p12), %s1457_s11, 4294966784  ;;  %p17_p13 = scmp.ge.s32.totalorder %s1815_s27, 4   ;;  %s2159_s21 = smov %s1730_s22 }
 0x4b2   : > { %s2160_s22 = smov %s1734_s23  ;;  %s2161_s23 = smov %s1826_s30 }
 0x4b3   : > { %s2162_s24 = smov %s1815_s27  ;;  %19 = sbr.rel (!%p17_p13) target bundleno = 4 (0x4), region = 92 }
 0x4b8   :  { %1462 = vsyncpa [#allocation3], 1 }
 0x4b9   :  { %1464 = vsyncpa [#allocation3 + $0x1], 1 }
 0x4ba   :  { %1465 = vsyncpa [#allocation4], 1 }
 0x4bb   :  { %1467 = vsyncpa [#allocation4 + $0x1], 1 }

</bundles_post_ra>
